<compile_context>
chip_gen: v7x
topology: tpu7x:2x2x1
jax: 0.10.0
libtpu: 0.0.40
codegen_flags: <defaults>
</compile_context>

<pallas_src>
import functools

import jax
import jax.numpy as jnp
from jax.experimental import pallas as pl
from jax.experimental.pallas import tpu as pltpu

SMOOTH = 0.0001


def _round_up(x, m):
    return ((x + m - 1) // m) * m


def _fb_bce_partial_kernel(p_ref, t_ref, out_ref, *, binary_targets):
    s = pl.program_id(2)  # reduction (spatial-step) axis
    tr = p_ref.shape[0]
    n_chunks = p_ref.shape[1] // 128

    acc_tp = jnp.zeros((tr, 128), jnp.float32)
    acc_p = jnp.zeros((tr, 128), jnp.float32)
    acc_t = jnp.zeros((tr, 128), jnp.float32)
    acc_bce = jnp.zeros((tr, 128), jnp.float32)

    # Streaming loop: one 128-lane chunk at a time, working set stays at vreg
    # scale; accumulators are carried in registers and written once per step.
    for i in range(n_chunks):
        lo = i * 128
        p = p_ref[:, lo:lo + 128].astype(jnp.float32)
        t = t_ref[:, lo:lo + 128].astype(jnp.float32)

        acc_p = acc_p + p
        acc_t = acc_t + t
        acc_tp = acc_tp + p * t

        if binary_targets:
            # One log/elem; only valid for hard {0,1} targets.
            bce_pos = jnp.maximum(
                jnp.log(t * p + (1.0 - t) * (1.0 - p)), -100.0)
        else:
            # nn.BCELoss semantics: each log term clamped at -100.  Positive
            # form t*log p + (1-t)*log(1-p); negated once in the wrapper.
            log_p = jnp.maximum(jnp.log(p), -100.0)
            log_1mp = jnp.maximum(jnp.log(1.0 - p), -100.0)
            bce_pos = t * (log_p - log_1mp) + log_1mp
        acc_bce = acc_bce + bce_pos

    # Single lane-dense (tr, 512) resident accumulator block:
    # [0:128)=sum(p*t)  [128:256)=sum(p)  [256:384)=sum(t)  [384:512)=sum(bce+)
    @pl.when(s == 0)
    def _init():
        out_ref[:, 0:128] = acc_tp
        out_ref[:, 128:256] = acc_p
        out_ref[:, 256:384] = acc_t
        out_ref[:, 384:512] = acc_bce

    @pl.when(s != 0)
    def _accum():
        out_ref[:, 0:128] += acc_tp
        out_ref[:, 128:256] += acc_p
        out_ref[:, 256:384] += acc_t
        out_ref[:, 384:512] += acc_bce


def fb_bce_loss(output, target, *, fb_weight=0.5, fb_beta=1.0, bce_weight=0.5,
                row_tile=32, spatial_tile=4096, assume_binary_targets=False):
    """output, target: (B, C, H, W) arrays in [0, 1]. Returns scalar f32 loss."""
    B, C, H, W = output.shape
    R = B * C
    S = H * W
    itemsize = jnp.dtype(output.dtype).itemsize

    # Native dtype into the kernel (f32 cast happens per-chunk on the VPU).
    p2 = output.reshape(R, S)
    t2 = target.reshape(R, S)

    # Row tile aligned to the packed sublane tile of the input dtype.
    row_align = {4: 8, 2: 16, 1: 32}.get(itemsize, 8)
    tr = _round_up(min(row_tile, _round_up(R, row_align)), row_align)
    # Favor >=2 row blocks when R allows it (keeps both v7x TCs busy).
    if _round_up(R, row_align) >= 2 * row_align:
        tr = min(tr, _round_up(R, 2 * row_align) // 2)
    R_pad = _round_up(R, tr)

    # Lane-dense spatial tile, never larger than the (padded) problem.
    ts = _round_up(min(spatial_tile, _round_up(S, 128)), 128)
    S_pad = _round_up(S, ts)

    # If there is only one row block but several spatial tiles, split the
    # spatial axis into 2 parallel groups with separate accumulator columns
    # (summed in the wrapper) so the parallel grid has >=2 blocks (v7x).
    n_split = 1
    if R_pad // tr < 2 and S_pad // ts >= 2:
        n_split = 2
        S_pad = _round_up(S_pad, ts * n_split)
    steps_per_split = S_pad // (ts * n_split)

    if (R_pad, S_pad) != (R, S):
        p2 = jnp.pad(p2, ((0, R_pad - R), (0, S_pad - S)))
        t2 = jnp.pad(t2, ((0, R_pad - R), (0, S_pad - S)))

    grid = (R_pad // tr, n_split, steps_per_split)

    in_spec = pl.BlockSpec(
        (tr, ts), lambda r, sp, s: (r, sp * steps_per_split + s))
    out_spec = pl.BlockSpec((tr, 512), lambda r, sp, s: (r, sp))
    out_shape = jax.ShapeDtypeStruct((R_pad, n_split * 512), jnp.float32)

    kernel = functools.partial(_fb_bce_partial_kernel,
                               binary_targets=assume_binary_targets)

    # Advisory cost so XLA schedules the surrounding pad/reductions sensibly.
    n_elem = R * S
    cost = pl.CostEstimate(
        flops=15 * n_elem,
        transcendentals=(1 if assume_binary_targets else 2) * n_elem,
        bytes_accessed=2 * R_pad * S_pad * itemsize + R_pad * n_split * 512 * 4,
    )

    acc = pl.pallas_call(
        kernel,
        out_shape=out_shape,
        grid_spec=pltpu.PrefetchScalarGridSpec(
            num_scalar_prefetch=0,
            grid=grid,
            in_specs=[in_spec, in_spec],
            out_specs=out_spec,
        ),
        compiler_params=pltpu.CompilerParams(
            dimension_semantics=("parallel", "parallel", "arbitrary"),
            # 32 MiB scoped VMEM is safe on all generations (v7x has only
            # 64 MiB physical per TC); tiles above fit with ample headroom.
            vmem_limit_bytes=32 * 1024 * 1024,
        ),
        cost_estimate=cost,
    )(p2, t2)

    # Tiny finalize in plain JAX (once per call, not per tile).
    sums = acc[:R].reshape(R, n_split, 4, 128).sum(axis=(1, 3))  # (R, 4)
    TP, SP, ST, BCE_pos = sums[:, 0], sums[:, 1], sums[:, 2], sums[:, 3]
    FP = SP - TP            # sum(p*(1-t)) = sum(p) - sum(p*t)
    FN = ST - TP            # sum((1-p)*t) = sum(t) - sum(p*t)

    beta2 = float(fb_beta) * float(fb_beta)
    weights = jnp.clip(ST, 0.0, 1.0)
    Fb = ((1.0 + beta2) * TP + SMOOTH) / (
        (1.0 + beta2) * TP + beta2 * FN + FP + SMOOTH)
    score = jnp.clip(jnp.sum(Fb * weights) / (jnp.sum(weights) + SMOOTH),
                     0.0, 1.0)
    fb_loss_val = 1.0 - score

    bce_mean = -jnp.sum(BCE_pos) / float(R * S)   # padded elems contribute 0

    return float(fb_weight) * fb_loss_val + float(bce_weight) * bce_mean


def _reference(output, target, fb_weight=0.5, fb_beta=1.0, bce_weight=0.5):
    # pure-JAX reference mirroring the PyTorch module
    B, C = output.shape[:2]
    p = output.reshape(B, C, -1).astype(jnp.float32)
    t = target.reshape(B, C, -1).astype(jnp.float32)
    beta2 = fb_beta * fb_beta
    w = jnp.clip(t.sum(-1), 0.0, 1.0)
    TP = (p * t).sum(2)
    FP = (p * (1 - t)).sum(2)
    FN = ((1 - p) * t).sum(2)
    Fb = ((1 + beta2) * TP + SMOOTH) / ((1 + beta2) * TP + beta2 * FN + FP + SMOOTH)
    Fb = Fb * w
    score = jnp.clip(Fb.sum() / (w.sum() + SMOOTH), 0.0, 1.0)
    fb = (1.0 - score) * fb_weight
    bce = jnp.mean(-(t * jnp.maximum(jnp.log(p), -100.0)
                     + (1 - t) * jnp.maximum(jnp.log(1 - p), -100.0))) * bce_weight
    return fb + bce


if __name__ == "__main__":
    key = jax.random.PRNGKey(0)
    k1, k2 = jax.random.split(key)
    B, C, H, W = 2, 4, 16, 16
    # predictions in (0,1) (as expected by BCELoss), binary targets
    output = jax.nn.sigmoid(jax.random.normal(k1, (B, C, H, W), jnp.float32))
    target = (jax.random.uniform(k2, (B, C, H, W)) > 0.5).astype(jnp.float32)

    loss = jax.block_until_ready(fb_bce_loss(output, target))
    ref = _reference(output, target)
    assert jnp.allclose(loss, ref, rtol=1e-5, atol=1e-5), (loss, ref)
    print("KERNEL_OK")
</pallas_src>

<mosaic_0001>
module attributes {stable_mosaic.version = 11 : i64} {
  func.func @_fb_bce_partial_kernel(%arg0: i32, %arg1: i32, %arg2: i32, %arg3: memref<8x256xf32, #tpu.memory_space<vmem>>, %arg4: memref<8x256xf32, #tpu.memory_space<vmem>>, %arg5: memref<8x512xf32, #tpu.memory_space<vmem>>) attributes {dimension_semantics = [#tpu.dimension_semantics<parallel>, #tpu.dimension_semantics<parallel>, #tpu.dimension_semantics<arbitrary>], iteration_bounds = array<i64: 1, 1, 1>, scalar_prefetch = 0 : i64, scratch_operands = 0 : i64, tpu.core_type = #tpu.core_type<tc>, window_params = [{transform_indices = @transform_0, window_bounds = array<i64: 8, 256>}, {transform_indices = @transform_1, window_bounds = array<i64: 8, 256>}, {transform_indices = @transform_2, window_bounds = array<i64: 8, 512>}]} {
    %cst = arith.constant 0.000000e+00 : f32
    %0 = vector.broadcast %cst : f32 to vector<8x128xf32>
    %cst_0 = arith.constant 0.000000e+00 : f32
    %1 = vector.broadcast %cst_0 : f32 to vector<8x128xf32>
    %cst_1 = arith.constant 0.000000e+00 : f32
    %2 = vector.broadcast %cst_1 : f32 to vector<8x128xf32>
    %cst_2 = arith.constant 0.000000e+00 : f32
    %3 = vector.broadcast %cst_2 : f32 to vector<8x128xf32>
    %c0 = arith.constant 0 : index
    %c0_3 = arith.constant 0 : index
    %4 = vector.load %arg3[%c0, %c0_3] : memref<8x256xf32, #tpu.memory_space<vmem>>, vector<8x128xf32>
    %c0_4 = arith.constant 0 : index
    %c0_5 = arith.constant 0 : index
    %5 = vector.load %arg4[%c0_4, %c0_5] : memref<8x256xf32, #tpu.memory_space<vmem>>, vector<8x128xf32>
    %6 = arith.addf %1, %4 : vector<8x128xf32>
    %7 = arith.addf %2, %5 : vector<8x128xf32>
    %8 = arith.mulf %4, %5 : vector<8x128xf32>
    %9 = arith.addf %0, %8 : vector<8x128xf32>
    %10 = math.log %4 : vector<8x128xf32>
    %cst_6 = arith.constant -1.000000e+02 : f32
    %11 = vector.broadcast %cst_6 : f32 to vector<8x128xf32>
    %12 = arith.maximumf %10, %11 : vector<8x128xf32>
    %cst_7 = arith.constant 1.000000e+00 : f32
    %13 = vector.broadcast %cst_7 : f32 to vector<8x128xf32>
    %14 = arith.subf %13, %4 : vector<8x128xf32>
    %15 = math.log %14 : vector<8x128xf32>
    %cst_8 = arith.constant -1.000000e+02 : f32
    %16 = vector.broadcast %cst_8 : f32 to vector<8x128xf32>
    %17 = arith.maximumf %15, %16 : vector<8x128xf32>
    %18 = arith.subf %12, %17 : vector<8x128xf32>
    %19 = arith.mulf %5, %18 : vector<8x128xf32>
    %20 = arith.addf %19, %17 : vector<8x128xf32>
    %21 = arith.addf %3, %20 : vector<8x128xf32>
    %c0_9 = arith.constant 0 : index
    %c128 = arith.constant 128 : index
    %22 = vector.load %arg3[%c0_9, %c128] : memref<8x256xf32, #tpu.memory_space<vmem>>, vector<8x128xf32>
    %c0_10 = arith.constant 0 : index
    %c128_11 = arith.constant 128 : index
    %23 = vector.load %arg4[%c0_10, %c128_11] : memref<8x256xf32, #tpu.memory_space<vmem>>, vector<8x128xf32>
    %24 = arith.addf %6, %22 : vector<8x128xf32>
    %25 = arith.addf %7, %23 : vector<8x128xf32>
    %26 = arith.mulf %22, %23 : vector<8x128xf32>
    %27 = arith.addf %9, %26 : vector<8x128xf32>
    %28 = math.log %22 : vector<8x128xf32>
    %cst_12 = arith.constant -1.000000e+02 : f32
    %29 = vector.broadcast %cst_12 : f32 to vector<8x128xf32>
    %30 = arith.maximumf %28, %29 : vector<8x128xf32>
    %cst_13 = arith.constant 1.000000e+00 : f32
    %31 = vector.broadcast %cst_13 : f32 to vector<8x128xf32>
    %32 = arith.subf %31, %22 : vector<8x128xf32>
    %33 = math.log %32 : vector<8x128xf32>
    %cst_14 = arith.constant -1.000000e+02 : f32
    %34 = vector.broadcast %cst_14 : f32 to vector<8x128xf32>
    %35 = arith.maximumf %33, %34 : vector<8x128xf32>
    %36 = arith.subf %30, %35 : vector<8x128xf32>
    %37 = arith.mulf %23, %36 : vector<8x128xf32>
    %38 = arith.addf %37, %35 : vector<8x128xf32>
    %39 = arith.addf %21, %38 : vector<8x128xf32>
    %c0_i32 = arith.constant 0 : i32
    %40 = arith.cmpi eq, %arg2, %c0_i32 : i32
    %41 = arith.extui %40 : i1 to i32
    %c0_i32_15 = arith.constant 0 : i32
    %42 = arith.cmpi ne, %41, %c0_i32_15 : i32
    scf.if %42 {
      %c0_18 = arith.constant 0 : index
      %c0_19 = arith.constant 0 : index
      %46 = vector.load %arg5[%c0_18, %c0_19] : memref<8x512xf32, #tpu.memory_space<vmem>>, vector<8x128xf32>
      tpu.vector_store %arg5[%c0_18, %c0_19], %27 {strides = array<i32>} : memref<8x512xf32, #tpu.memory_space<vmem>>, vector<8x128xf32>,
      %c0_20 = arith.constant 0 : index
      %c128_21 = arith.constant 128 : index
      %47 = vector.load %arg5[%c0_20, %c128_21] : memref<8x512xf32, #tpu.memory_space<vmem>>, vector<8x128xf32>
      tpu.vector_store %arg5[%c0_20, %c128_21], %24 {strides = array<i32>} : memref<8x512xf32, #tpu.memory_space<vmem>>, vector<8x128xf32>,
      %c0_22 = arith.constant 0 : index
      %c256 = arith.constant 256 : index
      %48 = vector.load %arg5[%c0_22, %c256] : memref<8x512xf32, #tpu.memory_space<vmem>>, vector<8x128xf32>
      tpu.vector_store %arg5[%c0_22, %c256], %25 {strides = array<i32>} : memref<8x512xf32, #tpu.memory_space<vmem>>, vector<8x128xf32>,
      %c0_23 = arith.constant 0 : index
      %c384 = arith.constant 384 : index
      %49 = vector.load %arg5[%c0_23, %c384] : memref<8x512xf32, #tpu.memory_space<vmem>>, vector<8x128xf32>
      tpu.vector_store %arg5[%c0_23, %c384], %39 {strides = array<i32>} : memref<8x512xf32, #tpu.memory_space<vmem>>, vector<8x128xf32>,
    } else {
    }
    %c0_i32_16 = arith.constant 0 : i32
    %43 = arith.cmpi ne, %arg2, %c0_i32_16 : i32
    %44 = arith.extui %43 : i1 to i32
    %c0_i32_17 = arith.constant 0 : i32
    %45 = arith.cmpi ne, %44, %c0_i32_17 : i32
    scf.if %45 {
      %c0_18 = arith.constant 0 : index
      %c0_19 = arith.constant 0 : index
      %46 = vector.load %arg5[%c0_18, %c0_19] : memref<8x512xf32, #tpu.memory_space<vmem>>, vector<8x128xf32>
      %47 = arith.addf %46, %27 : vector<8x128xf32>
      %c0_20 = arith.constant 0 : index
      %c0_21 = arith.constant 0 : index
      %48 = vector.load %arg5[%c0_20, %c0_21] : memref<8x512xf32, #tpu.memory_space<vmem>>, vector<8x128xf32>
      tpu.vector_store %arg5[%c0_20, %c0_21], %47 {strides = array<i32>} : memref<8x512xf32, #tpu.memory_space<vmem>>, vector<8x128xf32>,
      %c0_22 = arith.constant 0 : index
      %c128_23 = arith.constant 128 : index
      %49 = vector.load %arg5[%c0_22, %c128_23] : memref<8x512xf32, #tpu.memory_space<vmem>>, vector<8x128xf32>
      %50 = arith.addf %49, %24 : vector<8x128xf32>
      %c0_24 = arith.constant 0 : index
      %c128_25 = arith.constant 128 : index
      %51 = vector.load %arg5[%c0_24, %c128_25] : memref<8x512xf32, #tpu.memory_space<vmem>>, vector<8x128xf32>
      tpu.vector_store %arg5[%c0_24, %c128_25], %50 {strides = array<i32>} : memref<8x512xf32, #tpu.memory_space<vmem>>, vector<8x128xf32>,
      %c0_26 = arith.constant 0 : index
      %c256 = arith.constant 256 : index
      %52 = vector.load %arg5[%c0_26, %c256] : memref<8x512xf32, #tpu.memory_space<vmem>>, vector<8x128xf32>
      %53 = arith.addf %52, %25 : vector<8x128xf32>
      %c0_27 = arith.constant 0 : index
      %c256_28 = arith.constant 256 : index
      %54 = vector.load %arg5[%c0_27, %c256_28] : memref<8x512xf32, #tpu.memory_space<vmem>>, vector<8x128xf32>
      tpu.vector_store %arg5[%c0_27, %c256_28], %53 {strides = array<i32>} : memref<8x512xf32, #tpu.memory_space<vmem>>, vector<8x128xf32>,
      %c0_29 = arith.constant 0 : index
      %c384 = arith.constant 384 : index
      %55 = vector.load %arg5[%c0_29, %c384] : memref<8x512xf32, #tpu.memory_space<vmem>>, vector<8x128xf32>
      %56 = arith.addf %55, %39 : vector<8x128xf32>
      %c0_30 = arith.constant 0 : index
      %c384_31 = arith.constant 384 : index
      %57 = vector.load %arg5[%c0_30, %c384_31] : memref<8x512xf32, #tpu.memory_space<vmem>>, vector<8x128xf32>
      tpu.vector_store %arg5[%c0_30, %c384_31], %56 {strides = array<i32>} : memref<8x512xf32, #tpu.memory_space<vmem>>, vector<8x128xf32>,
    } else {
    }
    return
  }
  func.func @transform_0(%arg0: i32, %arg1: i32, %arg2: i32) -> (i32, i32) {
    %c1_i32 = arith.constant 1 : i32
    %0 = arith.muli %arg1, %c1_i32 : i32
    %1 = arith.addi %0, %arg2 : i32
    %c0_i32 = arith.constant 0 : i32
    return %arg0, %1 : i32, i32
  }
  func.func @transform_1(%arg0: i32, %arg1: i32, %arg2: i32) -> (i32, i32) {
    %c1_i32 = arith.constant 1 : i32
    %0 = arith.muli %arg1, %c1_i32 : i32
    %1 = arith.addi %0, %arg2 : i32
    %c0_i32 = arith.constant 0 : i32
    return %arg0, %1 : i32, i32
  }
  func.func @transform_2(%arg0: i32, %arg1: i32, %arg2: i32) -> (i32, i32) {
    %c0_i32 = arith.constant 0 : i32
    return %arg0, %arg1 : i32, i32
  }
}

</mosaic_0001>

<bundles_post_ra>
// kernel: tpu_custom_call.1
= control target key start
LH: loop header
LB: loop body
LE: loop exit
PB: predicated region body
PF: predicated region fallthrough
CT: control target
= control target key end

     0   :  { %7 = vsyncpa [#allocation3], 0  ;;  %s259_s0 = inlined_call_operand.hbm [shape: f32[8,256], index: 0, kind: input, shape index: {}]   ;;  %s260_s1 = inlined_call_operand.hbm [shape: f32[8,256], index: 1, kind: input, shape index: {}]   ;;  %s261_s2 = inlined_call_operand.hbm [shape: f32[8,512], index: 2, kind: output, shape index: {}]  }
   0x1   :  { %8 = vsyncpa [#allocation6], 0 }
   0x2   :  { %9 = vsyncpa [#allocation4], 0  ;;  %s205_s9 = smov [#allocation2]   ;;  %s206_s11 = smov [#allocation5]  }
   0x3   :  { %s20_s10 = sshll.u32 %s205_s9, 4  ;;  %s34_s12 = sshll.u32 %s206_s11, 4  ;;  %s21_s10 = int_to_ptr.vmem [resolvable:$true] %s20_s10  ;;  %s35_s12 = int_to_ptr.vmem [resolvable:$true] %s34_s12 }
   0x4   :  { %s133_s15 = scalar_lea.hbm %s259_s0, 256 }
   0x5   :  { %p134_p0 = scmp.ne.s32.totalorder %s259_s0, %s133_s15  ;;  %p137_p1 = scmp.lt.u32.totalorder %s133_s15, %s259_s0 }
   0x7   :  { %p139_p2 = pnand %p137_p1, %p134_p0 }
   0x9   :  { %142 = shalt.err (!%p139_p2)
}
   0xa   :  { %s143_s20 = scalar_lea.vmem %s21_s10, 256  ;;  %p148_p4 = scmp.lt.s32.totalorder %s21_s10, %s21_s10 }
   0xb   :  { %p144_p3 = scmp.ne.s32.totalorder %s21_s10, %s143_s20  ;;  %p149_p5 = scmp.lt.s32.totalorder %s143_s20, %s143_s20 }
   0xd   :  { %p150_p6 = por %p149_p5, %p148_p4 }
   0xf   :  { %p151_p7 = pnand %p150_p6, %p144_p3 }
  0x11   :  { %154 = shalt.err (!%p151_p7)
}
  0x12   :  { %23 = dma.hbm_to_vmem [thread:$0]  %s259_s0, 256, %s21_s10, [#allocation3]  }
  0x13   :  { %s155_s25 = scalar_lea.hbm %s260_s1, 256 }
  0x14   :  { %p156_p8 = scmp.ne.s32.totalorder %s260_s1, %s155_s25  ;;  %p159_p9 = scmp.lt.u32.totalorder %s155_s25, %s260_s1 }
  0x16   :  { %p161_p10 = pnand %p159_p9, %p156_p8 }
  0x18   :  { %164 = shalt.err (!%p161_p10)
}
  0x19   :  { %s165_s30 = scalar_lea.vmem %s35_s12, 256  ;;  %p170_p12 = scmp.lt.s32.totalorder %s35_s12, %s35_s12 }
  0x1a   :  { %p166_p11 = scmp.ne.s32.totalorder %s35_s12, %s165_s30  ;;  %p171_p13 = scmp.lt.s32.totalorder %s165_s30, %s165_s30 }
  0x1c   :  { %p172_p0 = por %p171_p13, %p170_p12 }
  0x1e   :  { %p173_p1 = pnand %p172_p0, %p166_p11 }
  0x20   :  { %176 = shalt.err (!%p173_p1)
}
  0x21   :  { %37 = dma.hbm_to_vmem [thread:$0]  %s260_s1, 256, %s35_s12, [#allocation6]  }
  0x22   :  { %199 = dma.done.wait [#allocation3], 256  }
  0x23   :  { %200 = vsyncadd [#allocation3], 4294967040 }
  0x24   :  { %201 = dma.done.wait [#allocation6], 256  }
  0x25   :  { %202 = vsyncadd [#allocation6], 4294967040  ;;  %v48_v0 = vld [vmem:[#allocation2] sm:$0xff]  ;;  %v49_v1 = vld [vmem:[#allocation5] sm:$0xff]  ;;  %s207_s1 = smov [#allocation7]  }
  0x26   :  { %v65_v2 = vld [vmem:[#allocation2 + $0x8] sm:$0xff]  ;;  %v52_v3 = vmul.f32 %v49_v1, %v48_v0  ;;  %125 = vlog2.f32 %v48_v0  ;;  %v66_v4 = vld [vmem:[#allocation5 + $0x8] sm:$0xff]  ;;  %v57_v6 = vsub.f32 1.0, %v48_v0  ;;  %s112_s4 = sshll.u32 %s207_s1, 4  ;;  %s113_s4 = int_to_ptr.vmem [resolvable:$true] %s112_s4 }
  0x27   :  { %v67_v5 = vadd.f32 %v65_v2, %v48_v0  ;;  %v69_v7 = vmul.f32 %v66_v4, %v65_v2  ;;  %127 = vlog2.f32 %v65_v2  ;;  %v68_v8 = vadd.f32 %v66_v4, %v49_v1  ;;  %s177_s5 = scalar_lea.vmem %s113_s4, 512  ;;  %p182_p3 = scmp.lt.s32.totalorder %s113_s4, %s113_s4 }
  0x28   :  { %v74_v9 = vsub.f32 1.0, %v65_v2  ;;  %129 = vlog2.f32 %v57_v6  ;;  %p178_p2 = scmp.ne.s32.totalorder %s113_s4, %s177_s5  ;;  %p183_p4 = scmp.lt.s32.totalorder %s177_s5, %s177_s5 }
  0x29   :  { %87 = vst [vmem:[#allocation7 + $0x8] sm:$0xff] %v67_v5  ;;  %v70_v10 = vadd.f32 %v69_v7, %v52_v3  ;;  %88 = vst [vmem:[#allocation7 + $0x10] sm:$0xff] %v68_v8 }
  0x2a   :  { %131 = vlog2.f32 %v74_v9  ;;  %p184_p5 = por %p183_p4, %p182_p3 }
  0x2b   :  { %86 = vst [vmem:[#allocation7] sm:$0xff] %v70_v10 }
  0x2c   :  { %p185_p6 = pnand %p184_p5, %p178_p2 }
  0x30   :  { %v126_v11 = vpop.eup %125 }
  0x31   :  { %v128_v12 = vpop.eup %127  ;;  %v55_v13 = vmul.f32 0.6931472, %v126_v11 }
  0x32   :  { %v130_v14 = vpop.eup %129  ;;  %v72_v15 = vmul.f32 0.6931472, %v128_v12 }
  0x33   :  { %v56_v17 = vmax.f32 %v55_v13, -100.0  ;;  %v59_v18 = vmul.f32 0.6931472, %v130_v14 }
  0x34   :  { %v132_v16 = vpop.eup %131  ;;  %v73_v19 = vmax.f32 %v72_v15, -100.0 }
  0x35   :  { %v76_v20 = vmul.f32 0.6931472, %v132_v16  ;;  %v60_v21 = vmax.f32 %v59_v18, -100.0 }
  0x37   :  { %v77_v22 = vmax.f32 %v76_v20, -100.0  ;;  %v61_v23 = vsub.f32 %v56_v17, %v60_v21 }
  0x39   :  { %v78_v24 = vsub.f32 %v73_v19, %v77_v22  ;;  %v62_v25 = vmul.f32 %v61_v23, %v49_v1 }
  0x3b   :  { %v79_v26 = vmul.f32 %v78_v24, %v66_v4  ;;  %v63_v27 = vadd.f32 %v62_v25, %v60_v21 }
  0x3d   :  { %v80_v28 = vadd.f32 %v79_v26, %v77_v22 }
  0x3f   :  { %v81_v29 = vadd.f32 %v80_v28, %v63_v27 }
  0x41   :  { %89 = vst [vmem:[#allocation7 + $0x18] sm:$0xff] %v81_v29 }
  0x42   :  { %188 = shalt.err (!%p185_p6)
}
  0x43   :  { %s189_s8 = scalar_lea.hbm %s261_s2, 512 }
  0x44   :  { %p190_p7 = scmp.ne.s32.totalorder %s261_s2, %s189_s8  ;;  %p193_p8 = scmp.lt.u32.totalorder %s189_s8, %s261_s2 }
  0x46   :  { %p195_p9 = pnand %p193_p8, %p190_p7 }
  0x48   :  { %198 = shalt.err (!%p195_p9)
}
  0x49   :  { %115 = dma.vmem_to_hbm [thread:$0]  %s113_s4, 512, %s261_s2, [#allocation4]  }
  0x4a   :  { %203 = dma.done.wait [#allocation4], 512  }
  0x4b   :  { %204 = vsyncadd [#allocation4], 4294966784 }
  0x4c   :  { %119 = vsyncpa [#allocation3], 1 }
  0x4d   :  { %120 = vsyncpa [#allocation6], 1 }
  0x4e   :  { %121 = vsyncpa [#allocation4], 1 }

</bundles_post_ra>
